<compile_context>
chip_gen: v7x
topology: tpu7x:2x2x1
jax: 0.10.0
libtpu: 0.0.40
codegen_flags: <defaults>
</compile_context>

<pallas_src>
import functools

import jax
import jax.numpy as jnp
from jax import lax
from jax.experimental import pallas as pl
from jax.experimental.pallas import tpu as pltpu

EPS = 1e-8


def _round_up(x, m):
    return (x + m - 1) // m * m


def _cos_partial_kernel(x1_ref, x2_ref, out_ref, *, num_channels, s_total,
                        tile_s):
    # x*_ref blocks: (C, TILE_S, 128) — last two dims are dense (8,128) vregs.
    if num_channels <= 64:
        # Channel reduction as plain vreg adds on dense (TILE_S,128) tiles.
        # Per-channel f32 cast keeps only two (TILE_S,128) f32 temps live
        # (no full-block f32 copy for bf16 inputs).
        a = x1_ref[0].astype(jnp.float32)
        b = x2_ref[0].astype(jnp.float32)
        w12 = a * b
        w1 = a * a
        w2 = b * b
        for ci in range(1, num_channels):
            a = x1_ref[ci].astype(jnp.float32)
            b = x2_ref[ci].astype(jnp.float32)
            w12 = w12 + a * b
            w1 = w1 + a * a
            w2 = w2 + b * b
    else:
        # Fat-channel path: leading-axis reduce is still plain vreg adds
        # (no XLU), at the cost of full-block f32 temps.
        x1 = x1_ref[...].astype(jnp.float32)
        x2 = x2_ref[...].astype(jnp.float32)
        w12 = jnp.sum(x1 * x2, axis=0)
        w1 = jnp.sum(x1 * x1, axis=0)
        w2 = jnp.sum(x2 * x2, axis=0)

    eps2 = jnp.float32(EPS * EPS)
    # Per-norm clamp (PyTorch semantics) folded into a single EUP rsqrt:
    # max(||a||,eps)*max(||b||,eps) == sqrt(max(w1,eps^2)*max(w2,eps^2)).
    cos = w12 * lax.rsqrt(jnp.maximum(w1, eps2) * jnp.maximum(w2, eps2))

    # Mask the padded sublane tail of a ragged last tile — trace-time
    # conditional, so exact tilings pay nothing.
    if s_total % tile_s != 0:
        j = pl.program_id(1)
        sub = lax.broadcasted_iota(jnp.int32, (tile_s, 128), 0)
        cos = jnp.where((j * tile_s + sub) < s_total, cos, jnp.float32(0.0))

    # One cross-lane/sublane reduce per tile; splat the scalar into this
    # step's private (8,128) output tile (wrapper reads [0, 0] only).
    partial = jnp.sum(cos)
    out_ref[...] = jnp.broadcast_to(partial, (8, 128))


def cosine_similarity_loss(x1, x2, *, max_block_bytes=2 * 1024 * 1024):
    """x1, x2: NCHW arrays (same shape). Returns scalar f32 loss."""
    assert x1.shape == x2.shape
    n, c, h, w = x1.shape
    hw = h * w
    m = n * hw

    # Free contiguous view to (N, C, HW). If HW is not a multiple of 128,
    # zero-pad the tail once (zeros contribute cos == 0, so the sum / m over
    # the true element count stays exact).
    hw_pad = _round_up(hw, 128)
    x1r = x1.reshape(n, c, hw)
    x2r = x2.reshape(n, c, hw)
    if hw_pad != hw:
        pad = ((0, 0), (0, 0), (0, hw_pad - hw))
        x1r = jnp.pad(x1r, pad)
        x2r = jnp.pad(x2r, pad)
    s_total = hw_pad // 128
    x1r = x1r.reshape(n, c, s_total, 128)
    x2r = x2r.reshape(n, c, s_total, 128)

    # Spatial (sublane) tile: multiple of 8 (or the full extent), sized so each
    # input block moves ~max_block_bytes per step. No hidden sublane padding in
    # this layout: block bytes = c * tile_s * 128 * elem_bytes.
    elem_bytes = jnp.dtype(x1.dtype).itemsize
    max_s = max(8, (max_block_bytes // (elem_bytes * c * 128)) // 8 * 8)
    if n == 1 and s_total >= 16:
        # v7x has 2 TensorCores: keep at least 2 parallel grid steps.
        max_s = min(max_s, _round_up(pl.cdiv(s_total, 2), 8))
    tile_s = s_total if s_total <= max_s else max_s
    grid_s = pl.cdiv(s_total, tile_s)
    grid = (n, grid_s)

    # Explicit VMEM budget: 2 inputs x 2 pipeline buffers x block, plus the
    # in-kernel f32 temps (w12/w1/w2/cos + per-channel a/b) and the tiny
    # double-buffered output tiles. Generous 2x headroom, clamped to stay
    # within v7x's 64 MiB physical VMEM.
    block_in_bytes = c * tile_s * 128 * elem_bytes
    f32_temps = 8 * tile_s * 128 * 4
    out_bytes = 2 * 8 * 128 * 4
    working = 2 * 2 * block_in_bytes + f32_temps + out_bytes
    vmem_limit = int(min(64 * 1024 * 1024, max(16 * 1024 * 1024, 2 * working)))

    kernel = functools.partial(
        _cos_partial_kernel, num_channels=c, s_total=s_total, tile_s=tile_s)

    partials = pl.pallas_call(
        kernel,
        out_shape=jax.ShapeDtypeStruct((n * grid_s, 8, 128), jnp.float32),
        grid_spec=pltpu.PrefetchScalarGridSpec(
            num_scalar_prefetch=0,
            grid=grid,
            in_specs=[
                pl.BlockSpec((None, c, tile_s, 128),
                             lambda i, j: (i, 0, j, 0)),
                pl.BlockSpec((None, c, tile_s, 128),
                             lambda i, j: (i, 0, j, 0)),
            ],
            out_specs=pl.BlockSpec((None, 8, 128),
                                   lambda i, j: (i * grid_s + j, 0, 0)),
        ),
        compiler_params=pltpu.CompilerParams(
            dimension_semantics=("parallel", "parallel"),
            vmem_limit_bytes=vmem_limit),
    )(x1r, x2r)

    # Only [0, 0] of each per-step tile carries data.
    total = jnp.sum(partials[:, 0, 0])
    return jnp.float32(1.0) - total / jnp.float32(m)


def _reference_loss(x1, x2):
    x1 = x1.astype(jnp.float32)
    x2 = x2.astype(jnp.float32)
    w12 = jnp.sum(x1 * x2, axis=1)
    w1 = jnp.sum(x1 * x1, axis=1)
    w2 = jnp.sum(x2 * x2, axis=1)
    denom = jnp.maximum(jnp.sqrt(w1), EPS) * jnp.maximum(jnp.sqrt(w2), EPS)
    cos = w12 / denom
    return 1.0 - jnp.mean(cos)


if __name__ == "__main__":
    key = jax.random.PRNGKey(0)
    k1, k2 = jax.random.split(key)
    # Small NCHW inputs consistent with the module's forward.
    x1 = jax.random.normal(k1, (2, 4, 16, 16), dtype=jnp.float32)
    x2 = jax.random.normal(k2, (2, 4, 16, 16), dtype=jnp.float32)

    loss = jax.jit(cosine_similarity_loss)(x1, x2)
    jax.block_until_ready(loss)

    ref = _reference_loss(x1, x2)
    assert jnp.allclose(loss, ref, atol=1e-5, rtol=1e-5), (loss, ref)
    print("KERNEL_OK")
</pallas_src>

<mosaic_0001>
module attributes {stable_mosaic.version = 11 : i64} {
  func.func @_cos_partial_kernel(%arg0: i32, %arg1: i32, %arg2: memref<1x4x2x128xf32, #tpu.memory_space<vmem>>, %arg3: memref<1x4x2x128xf32, #tpu.memory_space<vmem>>, %arg4: memref<1x8x128xf32, #tpu.memory_space<vmem>>) attributes {dimension_semantics = [#tpu.dimension_semantics<parallel>, #tpu.dimension_semantics<parallel>], iteration_bounds = array<i64: 2, 1>, scalar_prefetch = 0 : i64, scratch_operands = 0 : i64, tpu.core_type = #tpu.core_type<tc>, window_params = [{transform_indices = @transform_0, window_bounds = array<i64: 1, 4, 2, 128>}, {transform_indices = @transform_1, window_bounds = array<i64: 1, 4, 2, 128>}, {transform_indices = @transform_2, window_bounds = array<i64: 1, 8, 128>}]} {
    %c0 = arith.constant 0 : index
    %c0_0 = arith.constant 0 : index
    %c0_1 = arith.constant 0 : index
    %c0_2 = arith.constant 0 : index
    %0 = vector.load %arg2[%c0, %c0_0, %c0_1, %c0_2] : memref<1x4x2x128xf32, #tpu.memory_space<vmem>>, vector<1x1x2x128xf32>
    %1 = vector.shape_cast %0 : vector<1x1x2x128xf32> to vector<2x128xf32>
    %c0_3 = arith.constant 0 : index
    %c0_4 = arith.constant 0 : index
    %c0_5 = arith.constant 0 : index
    %c0_6 = arith.constant 0 : index
    %2 = vector.load %arg3[%c0_3, %c0_4, %c0_5, %c0_6] : memref<1x4x2x128xf32, #tpu.memory_space<vmem>>, vector<1x1x2x128xf32>
    %3 = vector.shape_cast %2 : vector<1x1x2x128xf32> to vector<2x128xf32>
    %4 = arith.mulf %1, %3 : vector<2x128xf32>
    %5 = arith.mulf %1, %1 : vector<2x128xf32>
    %6 = arith.mulf %3, %3 : vector<2x128xf32>
    %c0_7 = arith.constant 0 : index
    %c1 = arith.constant 1 : index
    %c0_8 = arith.constant 0 : index
    %c0_9 = arith.constant 0 : index
    %7 = vector.load %arg2[%c0_7, %c1, %c0_8, %c0_9] : memref<1x4x2x128xf32, #tpu.memory_space<vmem>>, vector<1x1x2x128xf32>
    %8 = vector.shape_cast %7 : vector<1x1x2x128xf32> to vector<2x128xf32>
    %c0_10 = arith.constant 0 : index
    %c1_11 = arith.constant 1 : index
    %c0_12 = arith.constant 0 : index
    %c0_13 = arith.constant 0 : index
    %9 = vector.load %arg3[%c0_10, %c1_11, %c0_12, %c0_13] : memref<1x4x2x128xf32, #tpu.memory_space<vmem>>, vector<1x1x2x128xf32>
    %10 = vector.shape_cast %9 : vector<1x1x2x128xf32> to vector<2x128xf32>
    %11 = arith.mulf %8, %10 : vector<2x128xf32>
    %12 = arith.addf %4, %11 : vector<2x128xf32>
    %13 = arith.mulf %8, %8 : vector<2x128xf32>
    %14 = arith.addf %5, %13 : vector<2x128xf32>
    %15 = arith.mulf %10, %10 : vector<2x128xf32>
    %16 = arith.addf %6, %15 : vector<2x128xf32>
    %c0_14 = arith.constant 0 : index
    %c2 = arith.constant 2 : index
    %c0_15 = arith.constant 0 : index
    %c0_16 = arith.constant 0 : index
    %17 = vector.load %arg2[%c0_14, %c2, %c0_15, %c0_16] : memref<1x4x2x128xf32, #tpu.memory_space<vmem>>, vector<1x1x2x128xf32>
    %18 = vector.shape_cast %17 : vector<1x1x2x128xf32> to vector<2x128xf32>
    %c0_17 = arith.constant 0 : index
    %c2_18 = arith.constant 2 : index
    %c0_19 = arith.constant 0 : index
    %c0_20 = arith.constant 0 : index
    %19 = vector.load %arg3[%c0_17, %c2_18, %c0_19, %c0_20] : memref<1x4x2x128xf32, #tpu.memory_space<vmem>>, vector<1x1x2x128xf32>
    %20 = vector.shape_cast %19 : vector<1x1x2x128xf32> to vector<2x128xf32>
    %21 = arith.mulf %18, %20 : vector<2x128xf32>
    %22 = arith.addf %12, %21 : vector<2x128xf32>
    %23 = arith.mulf %18, %18 : vector<2x128xf32>
    %24 = arith.addf %14, %23 : vector<2x128xf32>
    %25 = arith.mulf %20, %20 : vector<2x128xf32>
    %26 = arith.addf %16, %25 : vector<2x128xf32>
    %c0_21 = arith.constant 0 : index
    %c3 = arith.constant 3 : index
    %c0_22 = arith.constant 0 : index
    %c0_23 = arith.constant 0 : index
    %27 = vector.load %arg2[%c0_21, %c3, %c0_22, %c0_23] : memref<1x4x2x128xf32, #tpu.memory_space<vmem>>, vector<1x1x2x128xf32>
    %28 = vector.shape_cast %27 : vector<1x1x2x128xf32> to vector<2x128xf32>
    %c0_24 = arith.constant 0 : index
    %c3_25 = arith.constant 3 : index
    %c0_26 = arith.constant 0 : index
    %c0_27 = arith.constant 0 : index
    %29 = vector.load %arg3[%c0_24, %c3_25, %c0_26, %c0_27] : memref<1x4x2x128xf32, #tpu.memory_space<vmem>>, vector<1x1x2x128xf32>
    %30 = vector.shape_cast %29 : vector<1x1x2x128xf32> to vector<2x128xf32>
    %31 = arith.mulf %28, %30 : vector<2x128xf32>
    %32 = arith.addf %22, %31 : vector<2x128xf32>
    %33 = arith.mulf %28, %28 : vector<2x128xf32>
    %34 = arith.addf %24, %33 : vector<2x128xf32>
    %35 = arith.mulf %30, %30 : vector<2x128xf32>
    %36 = arith.addf %26, %35 : vector<2x128xf32>
    %cst = arith.constant 1.000000e-16 : f32
    %37 = vector.broadcast %cst : f32 to vector<2x128xf32>
    %38 = arith.maximumf %34, %37 : vector<2x128xf32>
    %cst_28 = arith.constant 1.000000e-16 : f32
    %39 = vector.broadcast %cst_28 : f32 to vector<2x128xf32>
    %40 = arith.maximumf %36, %39 : vector<2x128xf32>
    %41 = arith.mulf %38, %40 : vector<2x128xf32>
    %42 = math.rsqrt %41 : vector<2x128xf32>
    %43 = arith.mulf %32, %42 : vector<2x128xf32>
    %44 = vector.shape_cast %43 : vector<2x128xf32> to vector<1x2x128xf32>
    %cst_29 = arith.constant dense<0.000000e+00> : vector<1xf32>
    %45 = vector.multi_reduction <add>, %44, %cst_29 [1, 2] : vector<1x2x128xf32> to vector<1xf32>
    %46 = vector.shape_cast %45 : vector<1xf32> to vector<1x1x1xf32>
    %47 = vector.extract %46[0, 0, 0] : f32 from vector<1x1x1xf32>
    %48 = vector.broadcast %47 : f32 to vector<8x128xf32>
    %c0_30 = arith.constant 0 : index
    %c0_31 = arith.constant 0 : index
    %c0_32 = arith.constant 0 : index
    %49 = vector.load %arg4[%c0_30, %c0_31, %c0_32] : memref<1x8x128xf32, #tpu.memory_space<vmem>>, vector<1x8x128xf32>
    %50 = vector.shape_cast %49 : vector<1x8x128xf32> to vector<8x128xf32>
    %51 = vector.shape_cast %48 : vector<8x128xf32> to vector<1x8x128xf32>
    tpu.vector_store %arg4[%c0_30, %c0_31, %c0_32], %51 {strides = array<i32>} : memref<1x8x128xf32, #tpu.memory_space<vmem>>, vector<1x8x128xf32>,
    return
  }
  func.func @transform_0(%arg0: i32, %arg1: i32) -> (i32, i32, i32, i32) {
    %c0_i32 = arith.constant 0 : i32
    %c0_i32_0 = arith.constant 0 : i32
    %c0_i32_1 = arith.constant 0 : i32
    return %arg0, %c0_i32, %arg1, %c0_i32_0 : i32, i32, i32, i32
  }
  func.func @transform_1(%arg0: i32, %arg1: i32) -> (i32, i32, i32, i32) {
    %c0_i32 = arith.constant 0 : i32
    %c0_i32_0 = arith.constant 0 : i32
    %c0_i32_1 = arith.constant 0 : i32
    return %arg0, %c0_i32, %arg1, %c0_i32_0 : i32, i32, i32, i32
  }
  func.func @transform_2(%arg0: i32, %arg1: i32) -> (i32, i32, i32) {
    %c1_i32 = arith.constant 1 : i32
    %0 = arith.muli %arg0, %c1_i32 : i32
    %1 = arith.addi %0, %arg1 : i32
    %c0_i32 = arith.constant 0 : i32
    %c0_i32_0 = arith.constant 0 : i32
    %c0_i32_1 = arith.constant 0 : i32
    return %1, %c0_i32, %c0_i32_0 : i32, i32, i32
  }
}

</mosaic_0001>

<bundles_post_ra>
// kernel: cosine_similarity_loss.1
= control target key start
LH: loop header
LB: loop body
LE: loop exit
PB: predicated region body
PF: predicated region fallthrough
CT: control target
= control target key end

     0   :  { %s430_s9 = smov 0   ;;  %s432_s10 = smov 0   ;;  %s471_s0 = inlined_call_operand.vmem [shape: f32[2,4,2,128], index: 0, kind: input, shape index: {}]   ;;  %s472_s1 = inlined_call_operand.vmem [shape: f32[2,4,2,128], index: 1, kind: input, shape index: {}]   ;;  %s473_s2 = inlined_call_operand.vmem [shape: f32[2,8,128], index: 2, kind: output, shape index: {}]  }
   0x1   :  { %s434_s11 = smov 0  }
   0x2 LB: > { %s24_s12 = sadd.s32 1, %s409_s10  ;;  %p347_p0 = scmp.ge.s32.totalorder %s413_s11, 1  ;;  %s413_s11 = sphi %s434_s11, %s12_s11   ;;  %s409_s10 = sphi %s432_s10, %s475_s10   ;;  %s405_s9 = sphi %s430_s9, %s474_s9  }
   0x3   : > { %p26_p1 = scmp.ge.s32.totalorder %s24_s12, 2  ;;  %p146_p2 = scmp.lt.s32.totalorder %s413_s11, 3 }
   0x5   : > { %s477_s12 = smov (%p26_p1, %s24_s12), 0  ;;  %p147_p3 = pnand %p347_p0, %p146_p2 }
   0x6   : > { %p179_p4 = scmp.lt.s32.totalorder (!%p147_p3), %s405_s9, 1  ;;  %vm241_vm0 = vcmask (!%p147_p3), 1041408  }
   0x7   : > { %150 = sbr.rel (%p147_p3) target bundleno = 251 (0xfb), region = 28 }
   0xe   : > { %s479_s9 = smov (!%p179_p4, %s405_s9), 1 }
   0xf   : > { %s448_s13 = sshll.u32 %s479_s9, 3 }
  0x10   : > { %s186_s16 = scalar_lea.vmem %s471_s0, %s448_s13  ;;  %s194_s19 = scalar_lea.vmem %s472_s1, %s448_s13 }
  0x11   : > { %v201_v0 = vld [vmem:[%s186_s16] sm:$0x3]  ;;  %v353_v2 = vld [vmem:[%s186_s16 + $0x2] sm:$0x3]  ;;  %v355_v7 = vld [vmem:[%s186_s16 + $0x4] sm:$0x3]  ;;  %s199_s22 = scalar_lea.vmem %s473_s2, %s448_s13 }
  0x12   : > { %v202_v1 = vld [vmem:[%s194_s19] sm:$0x3]  ;;  %v204_v3 = vmul.f32 %v201_v0, %v201_v0  ;;  %v354_v5 = vld [vmem:[%s194_s19 + $0x2] sm:$0x3]  ;;  %v212_v6 = vmul.f32 %v353_v2, %v353_v2  ;;  %v356_v8 = vld [vmem:[%s194_s19 + $0x4] sm:$0x3]  ;;  %v222_v10 = vmul.f32 %v355_v7, %v355_v7 }
  0x13   : > { %v205_v4 = vmul.f32 %v202_v1, %v202_v1  ;;  %v214_v9 = vmul.f32 %v354_v5, %v354_v5  ;;  %v357_v11 = vld [vmem:[%s186_s16 + $0x6] sm:$0x3]  ;;  %v224_v14 = vmul.f32 %v356_v8, %v356_v8  ;;  %v203_v22 = vmul.f32 %v202_v1, %v201_v0 }
  0x14   : > { %v358_v12 = vld [vmem:[%s194_s19 + $0x6] sm:$0x3]  ;;  %v213_v13 = vadd.f32 %v212_v6, %v204_v3  ;;  %v232_v15 = vmul.f32 %v357_v11, %v357_v11  ;;  %v210_v23 = vmul.f32 %v354_v5, %v353_v2  ;;  %v220_v28 = vmul.f32 %v356_v8, %v355_v7 }
  0x15   : > { %v215_v16 = vadd.f32 %v214_v9, %v205_v4  ;;  %v234_v17 = vmul.f32 %v358_v12, %v358_v12  ;;  %v230_v30 = vmul.f32 %v358_v12, %v357_v11 }
  0x16   : > { %v223_v18 = vadd.f32 %v222_v10, %v213_v13  ;;  %v211_v27 = vadd.f32 %v210_v23, %v203_v22 }
  0x17   : > { %v225_v19 = vadd.f32 %v224_v14, %v215_v16 }
  0x18   : > { %v233_v20 = vadd.f32 %v232_v15, %v223_v18  ;;  %v221_v29 = vadd.f32 %v220_v28, %v211_v27 }
  0x19   : > { %v235_v21 = vadd.f32 %v234_v17, %v225_v19 }
  0x1a   : > { %v236_v24 = vmax.f32 %v233_v20, 1e-16  ;;  %v231_v31 = vadd.f32 %v230_v30, %v221_v29 }
  0x1b   : > { %v237_v25 = vmax.f32 %v235_v21, 1e-16 }
  0x1d   : > { %v238_v26 = vmul.f32 %v237_v25, %v236_v24 }
  0x1f   : > { %389 = vrsqrt.f32 %v238_v26 }
  0x29   : > { %v390_v32 = vpop.eup %389 }
  0x2a   : > { %v240_v33 = vmul.f32 %v390_v32, %v231_v31 }
  0x2c   : > { %v242_v34 = vsel %vm241_vm0, %v240_v33, 0.0 }
  0x2d   : > { %243 = vadd.xlane.f32.xlu0 %v242_v34 }
  0xba   : > { %v244_v35 = vpop.xlane.xlu0 %243 }
  0xbb   : > { %v245_v36 = vrot.slane %v244_v35, 4 }
  0xbd   : > { %v246_v37 = vadd.f32 %v245_v36, %v244_v35 }
  0xbf   : > { %v247_v38 = vrot.slane %v246_v37, 2 }
  0xc1   : > { %v248_v39 = vadd.f32 %v247_v38, %v246_v37 }
  0xc3   : > { %v249_v40 = vrot.slane %v248_v39, 1 }
  0xc5   : > { %v250_v41 = vadd.f32 %v249_v40, %v248_v39 }
  0xc7   : > { %363 = vpush %v250_v41 }
  0xf8   : > { %s364_s23 = spop %363 }
  0xf9   : > { %v252_v42 = vstv %s364_s23 }
  0xfa   : > { %253 = vst [vmem:[%s199_s22] sm:$0xff] %v252_v42 }
  0xfb PF: > { %s12_s11 = sadd.s32 1, %s413_s11   ;;  %s474_s9 = smov %s409_s10 }
  0xfc   : > { %p9_p5 = scmp.ge.s32.totalorder %s12_s11, 4   ;;  %s475_s10 = smov %s477_s12 }
  0xfe   :  { %11 = sbr.rel (!%p9_p5) target bundleno = 2 (0x2), region = 67 }

</bundles_post_ra>
